<compile_context>
chip_gen: v7x
topology: tpu7x:2x2x1
jax: 0.10.0
libtpu: 0.0.40
codegen_flags: <defaults>
</compile_context>

<pallas_src>
import functools

import jax
import jax.numpy as jnp
from jax.experimental import pallas as pl
from jax.experimental.pallas import tpu as pltpu

HIDDEN = 32          # config.hidden_size
DROPOUT_P = 0.1      # config.hidden_dropout_prob
EPS = 1e-5

LANE = 128           # vreg lane width
MAX_ROWS = 1024      # max rows per grid step (f32 tile <= 512 KiB; safe on
                     # v5e/v6e 128 MiB and v7x 64 MiB VMEM with double buffering)


# ---------------------------------------------------------------------------
# Kernel 1: LayerNorm over the hidden (last) axis.  One-pass mean / variance.
# ---------------------------------------------------------------------------
def _layernorm_kernel(x_ref, gamma_ref, beta_ref, o_ref):
    x = x_ref[...].astype(jnp.float32)
    h = x.shape[-1]
    inv_h = jnp.float32(1.0 / h)
    s1 = jnp.sum(x, axis=-1, keepdims=True)
    s2 = jnp.sum(x * x, axis=-1, keepdims=True)
    mean = s1 * inv_h
    var = s2 * inv_h - mean * mean
    inv = jax.lax.rsqrt(var + jnp.float32(EPS))
    y = (x - mean) * inv
    y = y * gamma_ref[...].astype(jnp.float32) + beta_ref[...].astype(jnp.float32)
    o_ref[...] = y.astype(o_ref.dtype)


def layernorm_pallas(x2d, gamma, beta):
    n, h = x2d.shape
    # Single grid step when the whole slab fits; otherwise 1024-row tiles
    # (multiple of 8) with zero-padding of the row axis.
    tile = n if n <= MAX_ROWS else MAX_ROWS
    n_pad = pl.cdiv(n, tile) * tile
    x_in = x2d if n_pad == n else jnp.pad(x2d, ((0, n_pad - n), (0, 0)))

    out = pl.pallas_call(
        _layernorm_kernel,
        out_shape=jax.ShapeDtypeStruct((n_pad, h), x2d.dtype),
        grid_spec=pltpu.PrefetchScalarGridSpec(
            num_scalar_prefetch=0,
            grid=(n_pad // tile,),
            in_specs=[
                pl.BlockSpec((tile, h), lambda i: (i, 0)),
                pl.BlockSpec((1, h), lambda i: (0, 0)),
                pl.BlockSpec((1, h), lambda i: (0, 0)),
            ],
            out_specs=pl.BlockSpec((tile, h), lambda i: (i, 0)),
        ),
        compiler_params=pltpu.CompilerParams(dimension_semantics=("parallel",)),
    )(x_in, gamma.reshape(1, h), beta.reshape(1, h))
    return out[:n]


# ---------------------------------------------------------------------------
# Kernel 2: fused dropout + residual add on a lane-dense (rows, 128) slab:
#           out = x + dropout(y)
# Counter-based hash PRNG (murmur3-style finalizer) -> integer threshold
# compare; no TPU-only PRNG primitives needed.
# ---------------------------------------------------------------------------
def _mix32(x):
    x = x + jnp.uint32(0x9E3779B9)
    x = (x ^ (x >> jnp.uint32(16))) * jnp.uint32(0x85EBCA6B)
    x = (x ^ (x >> jnp.uint32(13))) * jnp.uint32(0xC2B2AE35)
    return x ^ (x >> jnp.uint32(16))


def _residual_dropout_kernel(seed_ref, x_ref, y_ref, o_ref, *, p, training, tile):
    x = x_ref[...].astype(jnp.float32)
    y = y_ref[...].astype(jnp.float32)
    if training and p > 0.0:
        shape = y.shape
        rows = jax.lax.broadcasted_iota(jnp.uint32, shape, 0)
        lanes = jax.lax.broadcasted_iota(jnp.uint32, shape, 1)
        base = (pl.program_id(0) * tile).astype(jnp.uint32)
        idx = (base + rows) * jnp.uint32(shape[1]) + lanes     # global element id
        key = _mix32(seed_ref[0].astype(jnp.uint32))           # decorrelate seeds
        bits = _mix32(_mix32(idx ^ key))
        # signed 31-bit compare (safe on all generations + interpret fallback)
        bits_i = (bits & jnp.uint32(0x7FFFFFFF)).astype(jnp.int32)
        threshold = jnp.int32(min(int(round(p * (1 << 31))), (1 << 31) - 1))
        keep = bits_i >= threshold                             # P(keep) = 1 - p
        y = jnp.where(keep, y * jnp.float32(1.0 / (1.0 - p)), jnp.float32(0.0))
    o_ref[...] = (x + y).astype(o_ref.dtype)


def residual_dropout_pallas(x2d, y2d, *, p, training, seed):
    n, h = x2d.shape
    flat = n * h
    rows = pl.cdiv(flat, LANE)
    tile = rows if rows <= MAX_ROWS else MAX_ROWS
    rows_pad = pl.cdiv(rows, tile) * tile
    flat_pad = rows_pad * LANE

    def to_slab(a):
        a = a.reshape(flat)
        if flat_pad != flat:
            a = jnp.pad(a, (0, flat_pad - flat))
        return a.reshape(rows_pad, LANE)

    xs, ys = to_slab(x2d), to_slab(y2d)
    kernel = functools.partial(_residual_dropout_kernel,
                               p=p, training=training, tile=tile)
    out = pl.pallas_call(
        kernel,
        out_shape=jax.ShapeDtypeStruct((rows_pad, LANE), x2d.dtype),
        grid_spec=pltpu.PrefetchScalarGridSpec(
            num_scalar_prefetch=1,
            grid=(rows_pad // tile,),
            in_specs=[
                pl.BlockSpec((tile, LANE), lambda i, seed: (i, 0)),
                pl.BlockSpec((tile, LANE), lambda i, seed: (i, 0)),
            ],
            out_specs=pl.BlockSpec((tile, LANE), lambda i, seed: (i, 0)),
        ),
        compiler_params=pltpu.CompilerParams(dimension_semantics=("parallel",)),
    )(jnp.asarray([seed], jnp.int32), xs, ys)
    return out.reshape(flat_pad)[:flat].reshape(n, h)


# ---------------------------------------------------------------------------
# SubLayerConnection wrapper (matches the PyTorch module semantics).
# ---------------------------------------------------------------------------
class SubLayerConnection:
    def __init__(self, hidden_size, hidden_dropout_prob, key):
        self.size = hidden_size
        self.p = hidden_dropout_prob
        # nn.LayerNorm default init is ones/zeros; use deterministic non-trivial
        # synthetic values so the affine path is actually exercised.
        kg, kb = jax.random.split(key)
        self.gamma = 1.0 + 0.1 * jax.random.normal(kg, (hidden_size,), jnp.float32)
        self.beta = 0.01 * jax.random.normal(kb, (hidden_size,), jnp.float32)

    def __call__(self, x, graph_mask, sublayer, *, training=False, seed=0):
        b, s, h = x.shape
        x2d = x.reshape(b * s, h)
        normed = layernorm_pallas(x2d, self.gamma, self.beta).reshape(b, s, h)
        # TODO(synk): the sublayer is an arbitrary external callable (as in the
        # PyTorch module), so its matmul cannot be fused with the residual
        # epilogue without breaking the module's interface.
        sub_out = sublayer(normed, graph_mask)
        out2d = residual_dropout_pallas(
            x2d, sub_out.reshape(b * s, h), p=self.p, training=training, seed=seed)
        return out2d.reshape(b, s, h)


# ---------------------------------------------------------------------------
# A simple deterministic "sublayer" (graph aggregation + linear), plain JAX,
# standing in for the attention/FFN sublayer passed in at forward time.
# ---------------------------------------------------------------------------
def make_sublayer(key, hidden_size):
    w = 0.02 * jax.random.normal(key, (hidden_size, hidden_size), jnp.float32)

    def sublayer(h, graph_mask):
        deg = jnp.maximum(graph_mask.sum(-1, keepdims=True), 1.0)
        agg = jnp.einsum('bij,bjh->bih', graph_mask / deg, h)
        return agg @ w

    return sublayer


def reference_forward(x, graph_mask, gamma, beta, sublayer):
    mean = x.mean(-1, keepdims=True)
    var = ((x - mean) ** 2).mean(-1, keepdims=True)
    normed = (x - mean) / jnp.sqrt(var + EPS) * gamma + beta
    return x + sublayer(normed, graph_mask)   # dropout identity (eval mode)


if __name__ == "__main__":
    key = jax.random.PRNGKey(0)
    k_x, k_m, k_w, k_p = jax.random.split(key, 4)

    B, S, H = 2, 8, HIDDEN
    x = jax.random.normal(k_x, (B, S, H), jnp.float32)
    graph_mask = (jax.random.uniform(k_m, (B, S, S)) > 0.5).astype(jnp.float32)

    sublayer = make_sublayer(k_w, H)
    module = SubLayerConnection(H, DROPOUT_P, k_p)

    # Eval-mode run (dropout = identity) -> check against pure-JAX reference.
    out_eval = module(x, graph_mask, sublayer, training=False)
    jax.block_until_ready(out_eval)
    ref = reference_forward(x, graph_mask, module.gamma, module.beta, sublayer)
    assert jnp.allclose(out_eval, ref, atol=1e-5, rtol=1e-5), "mismatch vs reference"

    # Training-mode run exercises the in-kernel dropout path.
    out_train = module(x, graph_mask, sublayer, training=True, seed=1234)
    jax.block_until_ready(out_train)
    assert out_train.shape == x.shape

    # Validate dropout semantics: each element's residual delta is either 0
    # (dropped) or the eval delta scaled by 1/(1-p) (kept).
    scale = 1.0 / (1.0 - DROPOUT_P)
    d_train = out_train - x
    d_eval = out_eval - x
    ok = jnp.isclose(d_train, 0.0, atol=1e-6) | jnp.isclose(
        d_train, d_eval * scale, atol=1e-5, rtol=1e-4)
    assert bool(jnp.all(ok)), "dropout output is not {0, scaled} per element"
    dropped_frac = float(jnp.mean(jnp.isclose(d_train, 0.0, atol=1e-6)
                                  & ~jnp.isclose(d_eval, 0.0, atol=1e-6)))
    assert 0.0 < dropped_frac < 0.4, f"implausible dropout rate {dropped_frac}"

    print("KERNEL_OK")
</pallas_src>

<mosaic_0001>
module attributes {stable_mosaic.version = 11 : i64} {
  func.func @_layernorm_kernel(%arg0: i32, %arg1: memref<16x32xf32, #tpu.memory_space<vmem>>, %arg2: memref<1x32xf32, #tpu.memory_space<vmem>>, %arg3: memref<1x32xf32, #tpu.memory_space<vmem>>, %arg4: memref<16x32xf32, #tpu.memory_space<vmem>>) attributes {dimension_semantics = [#tpu.dimension_semantics<parallel>], iteration_bounds = array<i64: 1>, scalar_prefetch = 0 : i64, scratch_operands = 0 : i64, tpu.core_type = #tpu.core_type<tc>, window_params = [{transform_indices = @transform_0, window_bounds = array<i64: 16, 32>}, {pipeline_mode = #tpu.pipeline_mode<synchronous>, transform_indices = @transform_1, window_bounds = array<i64: 1, 32>}, {pipeline_mode = #tpu.pipeline_mode<synchronous>, transform_indices = @transform_2, window_bounds = array<i64: 1, 32>}, {transform_indices = @transform_3, window_bounds = array<i64: 16, 32>}]} {
    %c0 = arith.constant 0 : index
    %c0_0 = arith.constant 0 : index
    %0 = vector.load %arg1[%c0, %c0_0] : memref<16x32xf32, #tpu.memory_space<vmem>>, vector<16x32xf32>
    %cst = arith.constant dense<0.000000e+00> : vector<16xf32>
    %1 = vector.multi_reduction <add>, %0, %cst [1] : vector<16x32xf32> to vector<16xf32>
    %2 = vector.shape_cast %1 : vector<16xf32> to vector<16x1xf32>
    %3 = arith.mulf %0, %0 : vector<16x32xf32>
    %cst_1 = arith.constant dense<0.000000e+00> : vector<16xf32>
    %4 = vector.multi_reduction <add>, %3, %cst_1 [1] : vector<16x32xf32> to vector<16xf32>
    %5 = vector.shape_cast %4 : vector<16xf32> to vector<16x1xf32>
    %cst_2 = arith.constant 3.125000e-02 : f32
    %6 = vector.broadcast %cst_2 : f32 to vector<16x1xf32>
    %7 = arith.mulf %2, %6 : vector<16x1xf32>
    %cst_3 = arith.constant 3.125000e-02 : f32
    %8 = vector.broadcast %cst_3 : f32 to vector<16x1xf32>
    %9 = arith.mulf %5, %8 : vector<16x1xf32>
    %10 = arith.mulf %7, %7 : vector<16x1xf32>
    %11 = arith.subf %9, %10 : vector<16x1xf32>
    %cst_4 = arith.constant 9.99999974E-6 : f32
    %12 = vector.broadcast %cst_4 : f32 to vector<16x1xf32>
    %13 = arith.addf %11, %12 : vector<16x1xf32>
    %14 = math.rsqrt %13 : vector<16x1xf32>
    %15 = vector.broadcast %7 : vector<16x1xf32> to vector<16x32xf32>
    %16 = arith.subf %0, %15 : vector<16x32xf32>
    %17 = vector.broadcast %14 : vector<16x1xf32> to vector<16x32xf32>
    %18 = arith.mulf %16, %17 : vector<16x32xf32>
    %c0_5 = arith.constant 0 : index
    %c0_6 = arith.constant 0 : index
    %19 = vector.load %arg2[%c0_5, %c0_6] : memref<1x32xf32, #tpu.memory_space<vmem>>, vector<1x32xf32>
    %20 = vector.broadcast %19 : vector<1x32xf32> to vector<16x32xf32>
    %21 = arith.mulf %18, %20 : vector<16x32xf32>
    %c0_7 = arith.constant 0 : index
    %c0_8 = arith.constant 0 : index
    %22 = vector.load %arg3[%c0_7, %c0_8] : memref<1x32xf32, #tpu.memory_space<vmem>>, vector<1x32xf32>
    %23 = vector.broadcast %22 : vector<1x32xf32> to vector<16x32xf32>
    %24 = arith.addf %21, %23 : vector<16x32xf32>
    %c0_9 = arith.constant 0 : index
    %c0_10 = arith.constant 0 : index
    %25 = vector.load %arg4[%c0_9, %c0_10] : memref<16x32xf32, #tpu.memory_space<vmem>>, vector<16x32xf32>
    tpu.vector_store %arg4[%c0_9, %c0_10], %24 {strides = array<i32>} : memref<16x32xf32, #tpu.memory_space<vmem>>, vector<16x32xf32>,
    return
  }
  func.func @transform_0(%arg0: i32) -> (i32, i32) {
    %c0_i32 = arith.constant 0 : i32
    %c0_i32_0 = arith.constant 0 : i32
    return %arg0, %c0_i32 : i32, i32
  }
  func.func @transform_1(%arg0: i32) -> (i32, i32) {
    %c0_i32 = arith.constant 0 : i32
    %c0_i32_0 = arith.constant 0 : i32
    %c0_i32_1 = arith.constant 0 : i32
    return %c0_i32, %c0_i32_0 : i32, i32
  }
  func.func @transform_2(%arg0: i32) -> (i32, i32) {
    %c0_i32 = arith.constant 0 : i32
    %c0_i32_0 = arith.constant 0 : i32
    %c0_i32_1 = arith.constant 0 : i32
    return %c0_i32, %c0_i32_0 : i32, i32
  }
  func.func @transform_3(%arg0: i32) -> (i32, i32) {
    %c0_i32 = arith.constant 0 : i32
    %c0_i32_0 = arith.constant 0 : i32
    return %arg0, %c0_i32 : i32, i32
  }
}

</mosaic_0001>

<bundles_post_ra>
// kernel: tpu_custom_call.1
= control target key start
LH: loop header
LB: loop body
LE: loop exit
PB: predicated region body
PF: predicated region fallthrough
CT: control target
= control target key end

     0   :  { %8 = vsyncpa [#allocation3], 0  ;;  %s223_s0 = inlined_call_operand.hbm [shape: f32[16,32], index: 0, kind: input, shape index: {}]   ;;  %s224_s1 = inlined_call_operand.vmem [shape: f32[1,32], index: 1, kind: input, shape index: {}]   ;;  %s225_s2 = inlined_call_operand.vmem [shape: f32[1,32], index: 2, kind: input, shape index: {}]   ;;  %s226_s3 = inlined_call_operand.hbm [shape: f32[16,32], index: 3, kind: output, shape index: {}]  }
   0x1   :  { %9 = vsyncpa [#allocation4], 0  ;;  %s157_s12 = smov [#allocation2]   ;;  %s109_s16 = scalar_lea.hbm %s223_s0, 256 }
   0x2   :  { %s15_s13 = sshll.u32 %s157_s12, 4  ;;  %p110_p0 = scmp.ne.s32.totalorder %s223_s0, %s109_s16  ;;  %s16_s13 = int_to_ptr.vmem [resolvable:$true] %s15_s13 }
   0x3   :  { %p113_p1 = scmp.lt.u32.totalorder %s109_s16, %s223_s0 }
   0x5   :  { %p115_p2 = pnand %p113_p1, %p110_p0 }
   0x7   :  { %118 = shalt.err (!%p115_p2)
}
   0x8   :  { %s119_s21 = scalar_lea.vmem %s16_s13, 256  ;;  %p124_p4 = scmp.lt.s32.totalorder %s16_s13, %s16_s13 }
   0x9   :  { %p120_p3 = scmp.ne.s32.totalorder %s16_s13, %s119_s21  ;;  %p125_p5 = scmp.lt.s32.totalorder %s119_s21, %s119_s21 }
   0xb   :  { %p126_p6 = por %p125_p5, %p124_p4 }
   0xd   :  { %p127_p7 = pnand %p126_p6, %p120_p3 }
   0xf   :  { %130 = shalt.err (!%p127_p7)
}
  0x10   :  { %s158_s22 = smov 128   ;;  %s159_s23 = smov 8  }
  0x11   :  { %21 = dma.hbm_to_vmem [thread:$0]  %s223_s0, 256, %s16_s13, [#allocation3], %s158_s22, %s158_s22, %s159_s23  }
  0x12   :  { %153 = dma.done.wait [#allocation3], 256  }
  0x13   :  { %154 = vsyncadd [#allocation3], 4294967040  ;;  %vm31_vm0 = vcmask 261120   ;;  %v29_v0 = vld [vmem:[#allocation2] sm:$0xff]  ;;  %v30_v1 = vld [vmem:[#allocation2 + $0x8] sm:$0xff]  ;;  %s160_s29 = smov [#allocation5]  }
  0x14   :  { %v32_v2 = vsel %vm31_vm0, %v29_v0, 0.0  ;;  %v38_v3 = vmul.f32 %v29_v0, %v29_v0  ;;  %v39_v4 = vmul.f32 %v30_v1, %v30_v1  ;;  %v35_v6 = vsel %vm31_vm0, %v30_v1, 0.0  ;;  %v99_v24 = vld [vmem:[%s224_s1] ss:$0 sm:$0xff]  ;;  %s87_s30 = sshll.u32 %s160_s29, 4  ;;  %s88_s30 = int_to_ptr.vmem [resolvable:$true] %s87_s30 }
  0x15   :  { %33 = vadd.xlane.f32.xlu0 %v32_v2  ;;  %v100_v26 = vld [vmem:[%s225_s2] ss:$0 sm:$0xff]  ;;  %s131_s1 = scalar_lea.vmem %s88_s30, 256  ;;  %p136_p9 = scmp.lt.s32.totalorder %s88_s30, %s88_s30 }
  0x16   :  { %v40_v5 = vsel %vm31_vm0, %v38_v3, 0.0  ;;  %v43_v7 = vsel %vm31_vm0, %v39_v4, 0.0  ;;  %p132_p8 = scmp.ne.s32.totalorder %s88_s30, %s131_s1  ;;  %p137_p10 = scmp.lt.s32.totalorder %s131_s1, %s131_s1 }
  0x17   :  { %41 = vadd.xlane.f32.xlu1 %v40_v5 }
  0x18   :  { %p138_p11 = por %p137_p10, %p136_p9 }
  0x19   :  { %36 = vadd.xlane.f32.xlu0 %v35_v6 }
  0x1a   :  { %p139_p12 = pnand %p138_p11, %p132_p8 }
  0x1b   :  { %44 = vadd.xlane.f32.xlu1 %v43_v7 }
  0xa2   :  { %v34_v8 = vpop.xlane.xlu0 %33 }
  0xa3   :  { %v46_v9 = vmul.f32 0.03125, %v34_v8 }
  0xa4   :  { %v42_v10 = vpop.xlane.xlu1 %41 }
  0xa5   :  { %v50_v11 = vmul.f32 %v46_v9, %v46_v9  ;;  %v48_v12 = vmul.f32 0.03125, %v42_v10  ;;  %v58_v22 = vsub.f32 %v29_v0, %v46_v9 }
  0xa6   :  { %v37_v13 = vpop.xlane.xlu0 %36 }
  0xa7   :  { %v52_v14 = vsub.f32 %v48_v12, %v50_v11  ;;  %v47_v15 = vmul.f32 0.03125, %v37_v13 }
  0xa8   :  { %v45_v16 = vpop.xlane.xlu1 %44 }
  0xa9   :  { %v54_v17 = vadd.f32 1e-05, %v52_v14  ;;  %v51_v18 = vmul.f32 %v47_v15, %v47_v15  ;;  %v49_v19 = vmul.f32 0.03125, %v45_v16  ;;  %v59_v27 = vsub.f32 %v30_v1, %v47_v15 }
  0xab   :  { %105 = vrsqrt.f32 %v54_v17  ;;  %v53_v20 = vsub.f32 %v49_v19, %v51_v18 }
  0xad   :  { %v55_v21 = vadd.f32 1e-05, %v53_v20 }
  0xaf   :  { %107 = vrsqrt.f32 %v55_v21 }
  0xb5   :  { %v106_v23 = vpop.eup %105 }
  0xb6   :  { %v60_v25 = vmul.f32 %v106_v23, %v58_v22 }
  0xb8   :  { %v69_v28 = vmul.f32 %v99_v24, %v60_v25 }
  0xb9   :  { %v108_v29 = vpop.eup %107 }
  0xba   :  { %v61_v30 = vmul.f32 %v108_v29, %v59_v27  ;;  %v78_v31 = vadd.f32 %v100_v26, %v69_v28 }
  0xbc   :  { %v70_v32 = vmul.f32 %v99_v24, %v61_v30  ;;  %80 = vst.msk [vmem:[#allocation5] sm:$0xff] %vm31_vm0, %v78_v31 }
  0xbe   :  { %v79_v33 = vadd.f32 %v100_v26, %v70_v32 }
  0xc0   :  { %81 = vst.msk [vmem:[#allocation5 + $0x8] sm:$0xff] %vm31_vm0, %v79_v33 }
  0xc1   :  { %142 = shalt.err (!%p139_p12)
}
  0xc2   :  { %s143_s5 = scalar_lea.hbm %s226_s3, 256 }
  0xc3   :  { %p144_p13 = scmp.ne.s32.totalorder %s226_s3, %s143_s5  ;;  %p147_p0 = scmp.lt.u32.totalorder %s143_s5, %s226_s3 }
  0xc5   :  { %p149_p1 = pnand %p147_p0, %p144_p13 }
  0xc7   :  { %152 = shalt.err (!%p149_p1)
}
  0xc8   :  { %93 = dma.vmem_to_hbm [thread:$0]  %s88_s30, 256, %s226_s3, [#allocation4], %s158_s22, %s158_s22, %s159_s23  }
  0xc9   :  { %155 = dma.done.wait [#allocation4], 256  }
  0xca   :  { %156 = vsyncadd [#allocation4], 4294967040 }
  0xcb   :  { %97 = vsyncpa [#allocation3], 1 }
  0xcc   :  { %98 = vsyncpa [#allocation4], 1 }

</bundles_post_ra>
